<compile_context>
chip_gen: v7x
topology: tpu7x:2x2x1
jax: 0.10.0
libtpu: 0.0.40
codegen_flags: <defaults>
</compile_context>

<pallas_src>
import functools

import jax
import jax.numpy as jnp
from jax.experimental import pallas as pl
from jax.experimental.pallas import tpu as pltpu

EPS = 1e-5  # nn.BatchNorm1d default


def _round_up(a, b):
    return (a + b - 1) // b * b


def _tpu_budget():
    """(vmem_limit_bytes, default_row_tile) chosen per TPU generation."""
    try:
        cap = int(getattr(pltpu.get_tpu_info(), "vmem_capacity_bytes", 0))
    except Exception:          # no TPU info available -> be conservative (v7x VMEM)
        cap = 0
    if cap >= 96 * 1024 * 1024:            # v5e / v6e: 128 MiB physical VMEM
        return 100 * 1024 * 1024, 512
    return 48 * 1024 * 1024, 256           # v7x (64 MiB physical) / unknown


def _pick_tm(n, align, target):
    """Row-tile size: aligned, <= target, preferring divisors of n (no row padding)."""
    tm = max(align, min(_round_up(target, align), _round_up(n, align)))
    if n % tm == 0:
        return tm
    t = (tm // align) * align
    lo = max(align, tm // 2)
    while t >= lo:
        if n % t == 0:
            return t
        t -= align
    return tm


def _pick_tf(k, feat, itemsize, budget):
    """Feature-dim tile for a (k, feat) weight.

    If the whole weight fits the single-buffer budget it stays grid-invariant;
    otherwise its output-feature dim is tiled in multiples of 128 (double-buffered).
    """
    if k * feat * itemsize <= budget or feat % 128 != 0:
        return feat
    per_block = max(1, budget // 2)
    tf = min(feat, max(128, (per_block // (k * itemsize)) // 128 * 128))
    while feat % tf != 0:
        tf -= 128
    return tf


def _combine_stats(tile_sum, tile_m2, counts, n):
    """Chan's parallel-variance combine of per-tile (sum, centered M2)."""
    mean = jnp.sum(tile_sum, axis=0) / n                       # (1, D)
    delta = tile_sum / counts - mean                           # (G, 1, D)
    m2 = jnp.sum(tile_m2 + counts * delta * delta, axis=0)     # (1, D)
    var = jnp.maximum(m2 / n, 0.0)                             # biased var (BN normalize)
    return mean, jax.lax.rsqrt(var + EPS)


# ------------------------------ kernels --------------------------------------
def _matmul_stats_kernel(x_ref, w_ref, b_ref, y_ref, s_ref, m2_ref, *,
                         relu, n_rem, last_tile):
    """y = [relu](x @ w + b); stage y; per-tile sum & centered M2 of the staged y."""
    y = jnp.dot(x_ref[...], w_ref[...], preferred_element_type=jnp.float32)
    y = y + b_ref[...]
    if relu:
        y = jnp.maximum(y, 0.0)
    yc = y.astype(y_ref.dtype)
    y_ref[...] = yc
    yv = yc.astype(jnp.float32)       # stats from the staged values (self-consistent)
    tm = yv.shape[0]

    def _full_tile_stats():
        s = jnp.sum(yv, axis=0, keepdims=True)
        d = yv - s * (1.0 / tm)
        s_ref[...] = s[None]
        m2_ref[...] = jnp.sum(d * d, axis=0, keepdims=True)[None]

    if n_rem == 0:                    # trace-time: no padded rows anywhere
        _full_tile_stats()
    else:
        i = pl.program_id(1)          # row-tile axis (inner grid axis)

        @pl.when(i != last_tile)
        def _():
            _full_tile_stats()

        @pl.when(i == last_tile)      # ragged last tile: mask padded rows
        def _():
            rows = jax.lax.broadcasted_iota(jnp.int32, (tm, 1), 0)
            valid = rows < n_rem
            ym = jnp.where(valid, yv, 0.0)
            s = jnp.sum(ym, axis=0, keepdims=True)
            d = jnp.where(valid, yv - s * (1.0 / n_rem), 0.0)
            s_ref[...] = s[None]
            m2_ref[...] = jnp.sum(d * d, axis=0, keepdims=True)[None]


def _matmul_bias_kernel(x_ref, w_ref, b_ref, o_ref):
    o = jnp.dot(x_ref[...], w_ref[...], preferred_element_type=jnp.float32)
    o_ref[...] = (o + b_ref[...]).astype(o_ref.dtype)


# ------------------------------ wrapper ---------------------------------------
@functools.partial(
    jax.jit, static_argnames=("tm", "compute_dtype", "max_weight_block_bytes"))
def output_layer(x, w1, b1, w2, w3, b3, *, tm=None,
                 compute_dtype=jnp.bfloat16, max_weight_block_bytes=None):
    """x: (B, S, D1); w1: (D2, D1); b1: (D2,); w2: (D3, D2); w3: (OUT, D1); b3: (OUT,)."""
    B, S, D1 = x.shape
    D2 = w1.shape[0]
    D3 = w2.shape[0]
    OUT = w3.shape[0]
    assert w3.shape[1] == D3 == D1, "module requires linear3_in_dim == linear1_in_dim"

    N = B * S
    cdt = jnp.dtype(compute_dtype)
    csz = cdt.itemsize
    hp = jax.lax.Precision.HIGHEST

    vmem_limit, tm_default = _tpu_budget()
    row_align = 16 if csz < 4 else 8
    TM = _pick_tm(N, row_align, tm if tm is not None else tm_default)
    N_pad = _round_up(N, TM)
    G = N_pad // TM
    n_rem = 0 if N_pad == N else N - (G - 1) * TM      # valid rows in ragged last tile

    OUT_pad = OUT if (OUT < 128 or OUT % 128 == 0) else _round_up(OUT, 128)
    w_budget = (max_weight_block_bytes if max_weight_block_bytes is not None
                else vmem_limit // 3)
    TF1 = _pick_tf(D1, D2, csz, w_budget)
    TF2 = _pick_tf(D2, D3, csz, w_budget)
    TF3 = _pick_tf(D3, OUT_pad, csz, w_budget)
    F1, F2, F3 = D2 // TF1, D3 // TF2, OUT_pad // TF3

    cparams = pltpu.CompilerParams(
        dimension_semantics=("parallel", "parallel"),
        vmem_limit_bytes=vmem_limit,
    )

    # ---- BlockSpec helpers; grid = (feature_tiles, row_tiles), rows innermost ----
    def row_spec(feat):                 # streamed activation rows, full feature width
        return pl.BlockSpec((TM, feat), lambda j, i: (i, 0))

    def out_spec(tf):                   # row x feature tiled output
        return pl.BlockSpec((TM, tf), lambda j, i: (i, j))

    def col_spec(rows, tf, f):          # weights / biases (no row-tile dependence)
        if f == 1:                      # grid-invariant -> single pipeline buffer
            return pl.BlockSpec((rows, tf), lambda j, i: (0, j),
                                pipeline_mode=pl.Buffered(1))
        return pl.BlockSpec((rows, tf), lambda j, i: (0, j))

    def stat_spec(tf):                  # per-(row-tile, feature-tile) stats output
        return pl.BlockSpec((1, 1, tf), lambda j, i: (i, 0, j))

    # ---- parameter / input prep (small one-time XLA ops; fused under this jit) ----
    x2 = x.reshape(N, D1).astype(cdt)
    if N_pad != N:
        x2 = jnp.pad(x2, ((0, N_pad - N), (0, 0)))
    w1t = w1.T.astype(cdt)                                   # (D1, D2)
    b1c = b1.reshape(1, D2).astype(jnp.float32)

    if n_rem:
        counts = jnp.asarray([TM] * (G - 1) + [n_rem],
                             jnp.float32).reshape(G, 1, 1)
    else:
        counts = jnp.full((G, 1, 1), float(TM), jnp.float32)

    # ---- phase 1: h = relu(x @ w1^T + b1), per-tile stats of h -------------------
    h, s1, q1 = pl.pallas_call(
        functools.partial(_matmul_stats_kernel, relu=True, n_rem=n_rem,
                          last_tile=G - 1),
        grid=(F1, G),
        in_specs=[row_spec(D1), col_spec(D1, TF1, F1), col_spec(1, TF1, F1)],
        out_specs=[out_spec(TF1), stat_spec(TF1), stat_spec(TF1)],
        out_shape=[
            jax.ShapeDtypeStruct((N_pad, D2), cdt),
            jax.ShapeDtypeStruct((G, 1, D2), jnp.float32),
            jax.ShapeDtypeStruct((G, 1, D2), jnp.float32),
        ],
        compiler_params=cparams,
        cost_estimate=pl.CostEstimate(
            flops=2 * N_pad * D1 * D2, transcendentals=0,
            bytes_accessed=(F1 * N_pad * D1 + D1 * D2 + N_pad * D2) * csz
                           + 2 * G * D2 * 4),
    )(x2, w1t, b1c)

    # ---- fold BN1 into linear2: w2' = w2^T * istd1, b2' = -(mean1*istd1) @ w2^T ---
    mean1, istd1 = _combine_stats(s1, q1, counts, float(N))
    w2f = w2.astype(jnp.float32).T * istd1.reshape(D2, 1)        # (D2, D3)
    b2f = -jnp.dot(mean1, w2f, precision=hp)                     # (1, D3)
    w2c = w2f.astype(cdt)

    # ---- phase 2: h2 = h @ w2' + b2', per-tile stats of h2 -----------------------
    h2, s2, q2 = pl.pallas_call(
        functools.partial(_matmul_stats_kernel, relu=False, n_rem=n_rem,
                          last_tile=G - 1),
        grid=(F2, G),
        in_specs=[row_spec(D2), col_spec(D2, TF2, F2), col_spec(1, TF2, F2)],
        out_specs=[out_spec(TF2), stat_spec(TF2), stat_spec(TF2)],
        out_shape=[
            jax.ShapeDtypeStruct((N_pad, D3), cdt),
            jax.ShapeDtypeStruct((G, 1, D3), jnp.float32),
            jax.ShapeDtypeStruct((G, 1, D3), jnp.float32),
        ],
        compiler_params=cparams,
        cost_estimate=pl.CostEstimate(
            flops=2 * N_pad * D2 * D3, transcendentals=0,
            bytes_accessed=(F2 * N_pad * D2 + D2 * D3 + N_pad * D3) * csz
                           + 2 * G * D3 * 4),
    )(h, w2c, b2f)

    # ---- fold BN2 into linear3 ---------------------------------------------------
    mean2, istd2 = _combine_stats(s2, q2, counts, float(N))
    w3f = w3.astype(jnp.float32).T * istd2.reshape(D3, 1)        # (D3, OUT)
    b3f = b3.astype(jnp.float32).reshape(1, OUT) - jnp.dot(mean2, w3f, precision=hp)
    if OUT_pad != OUT:
        w3f = jnp.pad(w3f, ((0, 0), (0, OUT_pad - OUT)))
        b3f = jnp.pad(b3f, ((0, 0), (0, OUT_pad - OUT)))
    w3c = w3f.astype(cdt)

    # ---- phase 3: out = h2 @ w3' + b3' -------------------------------------------
    out = pl.pallas_call(
        _matmul_bias_kernel,
        grid=(F3, G),
        in_specs=[row_spec(D3), col_spec(D3, TF3, F3), col_spec(1, TF3, F3)],
        out_specs=out_spec(TF3),
        out_shape=jax.ShapeDtypeStruct((N_pad, OUT_pad), jnp.float32),
        compiler_params=cparams,
        cost_estimate=pl.CostEstimate(
            flops=2 * N_pad * D3 * OUT_pad, transcendentals=0,
            bytes_accessed=(F3 * N_pad * D3 + D3 * OUT_pad) * csz
                           + N_pad * OUT_pad * 4),
    )(h2, w3c, b3f)

    if N_pad != N or OUT_pad != OUT:
        out = out[:N, :OUT]
    return out.reshape(B, S, OUT)


def output_layer_ref(x, w1, b1, w2, w3, b3):
    """Pure-JAX f32 reference mirroring the PyTorch forward (training-mode BN)."""
    hp = jax.lax.Precision.HIGHEST
    h = jnp.maximum(jnp.matmul(x, w1.T, precision=hp) + b1, 0.0)
    m1 = h.mean(axis=(0, 1), keepdims=True)
    v1 = ((h - m1) ** 2).mean(axis=(0, 1), keepdims=True)
    h = (h - m1) / jnp.sqrt(v1 + EPS)
    h2 = jnp.matmul(h, w2.T, precision=hp)
    m2 = h2.mean(axis=(0, 1), keepdims=True)
    v2 = ((h2 - m2) ** 2).mean(axis=(0, 1), keepdims=True)
    h2 = (h2 - m2) / jnp.sqrt(v2 + EPS)
    return jnp.matmul(h2, w3.T, precision=hp) + b3


if __name__ == "__main__":
    def uinit(k, shape, fan_in):
        bound = 1.0 / jnp.sqrt(fan_in)
        return jax.random.uniform(k, shape, jnp.float32, -bound, bound)

    def make_case(key, B, S, D1, D2, D3, OUT):
        kx, k1, k1b, k2, k3, k3b = jax.random.split(key, 6)
        x = jax.random.normal(kx, (B, S, D1), dtype=jnp.float32)
        w1 = uinit(k1, (D2, D1), D1)
        b1 = uinit(k1b, (D2,), D1)
        w2 = uinit(k2, (D3, D2), D2)
        w3 = uinit(k3, (OUT, D1), D1)   # D3 == D1 required by the module itself
        b3 = uinit(k3b, (OUT,), D1)
        return x, w1, b1, w2, w3, b3

    key = jax.random.PRNGKey(0)
    k_a, k_b, k_c = jax.random.split(key, 3)

    # case 1: single row tile / single feature tile; bf16 production + strict f32.
    args1 = make_case(k_a, 2, 8, 32, 64, 32, 16)
    ref1 = output_layer_ref(*args1)
    out_bf16 = output_layer(*args1, compute_dtype=jnp.bfloat16)
    jax.block_until_ready(out_bf16)
    assert out_bf16.shape == ref1.shape
    assert jnp.allclose(out_bf16, ref1, atol=5e-2, rtol=5e-2)
    out_f32 = output_layer(*args1, compute_dtype=jnp.float32)
    jax.block_until_ready(out_f32)
    assert jnp.allclose(out_f32, ref1, atol=1e-2, rtol=1e-2)

    # case 2: N=60 with tm=16 -> 4 row tiles, ragged last tile (masked Chan stats).
    args2 = make_case(k_b, 3, 20, 32, 64, 32, 16)
    ref2 = output_layer_ref(*args2)
    out2 = output_layer(*args2, tm=16, compute_dtype=jnp.float32)
    jax.block_until_ready(out2)
    assert out2.shape == ref2.shape
    assert jnp.allclose(out2, ref2, atol=1e-2, rtol=1e-2)

    # case 3: force the feature-tiled weight path (D2=256 -> TF1=128, 2 feature
    # tiles) plus 3 row tiles; exercises the large-hidden-dim v7x code path small.
    args3 = make_case(k_c, 2, 12, 32, 256, 32, 16)
    ref3 = output_layer_ref(*args3)
    out3 = output_layer(*args3, tm=8, compute_dtype=jnp.float32,
                        max_weight_block_bytes=16 * 1024)
    jax.block_until_ready(out3)
    assert out3.shape == ref3.shape
    assert jnp.allclose(out3, ref3, atol=1e-2, rtol=1e-2)

    print("KERNEL_OK")
</pallas_src>

<mosaic_0001>
module attributes {stable_mosaic.version = 11 : i64} {
  func.func @_matmul_stats_kernel(%arg0: i32, %arg1: i32, %arg2: memref<16x32xbf16, #tpu.memory_space<vmem>>, %arg3: memref<32x64xbf16, #tpu.memory_space<vmem>>, %arg4: memref<1x64xf32, #tpu.memory_space<vmem>>, %arg5: memref<16x64xbf16, #tpu.memory_space<vmem>>, %arg6: memref<1x1x64xf32, #tpu.memory_space<vmem>>, %arg7: memref<1x1x64xf32, #tpu.memory_space<vmem>>) attributes {dimension_semantics = [#tpu.dimension_semantics<parallel>, #tpu.dimension_semantics<parallel>], iteration_bounds = array<i64: 1, 1>, scalar_prefetch = 0 : i64, scratch_operands = 0 : i64, tpu.core_type = #tpu.core_type<tc>, window_params = [{transform_indices = @transform_0, window_bounds = array<i64: 16, 32>}, {pipeline_mode = #tpu.pipeline_mode<synchronous>, transform_indices = @transform_1, window_bounds = array<i64: 32, 64>}, {pipeline_mode = #tpu.pipeline_mode<synchronous>, transform_indices = @transform_2, window_bounds = array<i64: 1, 64>}, {transform_indices = @transform_3, window_bounds = array<i64: 16, 64>}, {transform_indices = @transform_4, window_bounds = array<i64: 1, 1, 64>}, {transform_indices = @transform_5, window_bounds = array<i64: 1, 1, 64>}]} {
    %c0 = arith.constant 0 : index
    %c0_0 = arith.constant 0 : index
    %0 = vector.load %arg2[%c0, %c0_0] : memref<16x32xbf16, #tpu.memory_space<vmem>>, vector<16x32xbf16>
    %c0_1 = arith.constant 0 : index
    %c0_2 = arith.constant 0 : index
    %1 = vector.load %arg3[%c0_1, %c0_2] : memref<32x64xbf16, #tpu.memory_space<vmem>>, vector<32x64xbf16>
    %cst = arith.constant dense<0.000000e+00> : vector<16x64xf32>
    %2 = tpu.matmul %0, %1, %cst {dimension_numbers = #tpu.dot_dimension_numbers<[1], [0], [0], [1], [0, 0, 1, 1], [], []>} : vector<16x32xbf16>, vector<32x64xbf16>, vector<16x64xf32> -> vector<16x64xf32>
    %c0_3 = arith.constant 0 : index
    %c0_4 = arith.constant 0 : index
    %3 = vector.load %arg4[%c0_3, %c0_4] : memref<1x64xf32, #tpu.memory_space<vmem>>, vector<1x64xf32>
    %4 = vector.broadcast %3 : vector<1x64xf32> to vector<16x64xf32>
    %5 = arith.addf %2, %4 : vector<16x64xf32>
    %cst_5 = arith.constant 0.000000e+00 : f32
    %6 = vector.broadcast %cst_5 : f32 to vector<16x64xf32>
    %7 = arith.maximumf %5, %6 : vector<16x64xf32>
    %8 = arith.truncf %7 : vector<16x64xf32> to vector<16x64xbf16>
    %c0_6 = arith.constant 0 : index
    %c0_7 = arith.constant 0 : index
    %9 = vector.load %arg5[%c0_6, %c0_7] : memref<16x64xbf16, #tpu.memory_space<vmem>>, vector<16x64xbf16>
    tpu.vector_store %arg5[%c0_6, %c0_7], %8 {strides = array<i32>} : memref<16x64xbf16, #tpu.memory_space<vmem>>, vector<16x64xbf16>,
    %10 = arith.extf %8 : vector<16x64xbf16> to vector<16x64xf32>
    %cst_8 = arith.constant dense<0.000000e+00> : vector<64xf32>
    %11 = vector.multi_reduction <add>, %10, %cst_8 [0] : vector<16x64xf32> to vector<64xf32>
    %12 = vector.shape_cast %11 : vector<64xf32> to vector<1x64xf32>
    %cst_9 = arith.constant 6.250000e-02 : f32
    %13 = vector.broadcast %cst_9 : f32 to vector<1x64xf32>
    %14 = arith.mulf %12, %13 : vector<1x64xf32>
    %15 = vector.broadcast %14 : vector<1x64xf32> to vector<16x64xf32>
    %16 = arith.subf %10, %15 : vector<16x64xf32>
    %17 = vector.shape_cast %12 : vector<1x64xf32> to vector<1x1x64xf32>
    %c0_10 = arith.constant 0 : index
    %c0_11 = arith.constant 0 : index
    %c0_12 = arith.constant 0 : index
    %18 = vector.load %arg6[%c0_10, %c0_11, %c0_12] : memref<1x1x64xf32, #tpu.memory_space<vmem>>, vector<1x1x64xf32>
    tpu.vector_store %arg6[%c0_10, %c0_11, %c0_12], %17 {strides = array<i32>} : memref<1x1x64xf32, #tpu.memory_space<vmem>>, vector<1x1x64xf32>,
    %19 = arith.mulf %16, %16 : vector<16x64xf32>
    %cst_13 = arith.constant dense<0.000000e+00> : vector<64xf32>
    %20 = vector.multi_reduction <add>, %19, %cst_13 [0] : vector<16x64xf32> to vector<64xf32>
    %21 = vector.shape_cast %20 : vector<64xf32> to vector<1x64xf32>
    %22 = vector.shape_cast %21 : vector<1x64xf32> to vector<1x1x64xf32>
    %c0_14 = arith.constant 0 : index
    %c0_15 = arith.constant 0 : index
    %c0_16 = arith.constant 0 : index
    %23 = vector.load %arg7[%c0_14, %c0_15, %c0_16] : memref<1x1x64xf32, #tpu.memory_space<vmem>>, vector<1x1x64xf32>
    tpu.vector_store %arg7[%c0_14, %c0_15, %c0_16], %22 {strides = array<i32>} : memref<1x1x64xf32, #tpu.memory_space<vmem>>, vector<1x1x64xf32>,
    return
  }
  func.func @transform_0(%arg0: i32, %arg1: i32) -> (i32, i32) {
    %c0_i32 = arith.constant 0 : i32
    %c0_i32_0 = arith.constant 0 : i32
    return %arg1, %c0_i32 : i32, i32
  }
  func.func @transform_1(%arg0: i32, %arg1: i32) -> (i32, i32) {
    %c0_i32 = arith.constant 0 : i32
    %c0_i32_0 = arith.constant 0 : i32
    return %c0_i32, %arg0 : i32, i32
  }
  func.func @transform_2(%arg0: i32, %arg1: i32) -> (i32, i32) {
    %c0_i32 = arith.constant 0 : i32
    %c0_i32_0 = arith.constant 0 : i32
    return %c0_i32, %arg0 : i32, i32
  }
  func.func @transform_3(%arg0: i32, %arg1: i32) -> (i32, i32) {
    %c0_i32 = arith.constant 0 : i32
    return %arg1, %arg0 : i32, i32
  }
  func.func @transform_4(%arg0: i32, %arg1: i32) -> (i32, i32, i32) {
    %c0_i32 = arith.constant 0 : i32
    %c0_i32_0 = arith.constant 0 : i32
    return %arg1, %c0_i32, %arg0 : i32, i32, i32
  }
  func.func @transform_5(%arg0: i32, %arg1: i32) -> (i32, i32, i32) {
    %c0_i32 = arith.constant 0 : i32
    %c0_i32_0 = arith.constant 0 : i32
    return %arg1, %c0_i32, %arg0 : i32, i32, i32
  }
}

module attributes {stable_mosaic.version = 11 : i64} {
  func.func @_matmul_stats_kernel(%arg0: i32, %arg1: i32, %arg2: memref<16x64xbf16, #tpu.memory_space<vmem>>, %arg3: memref<64x32xbf16, #tpu.memory_space<vmem>>, %arg4: memref<1x32xf32, #tpu.memory_space<vmem>>, %arg5: memref<16x32xbf16, #tpu.memory_space<vmem>>, %arg6: memref<1x1x32xf32, #tpu.memory_space<vmem>>, %arg7: memref<1x1x32xf32, #tpu.memory_space<vmem>>) attributes {dimension_semantics = [#tpu.dimension_semantics<parallel>, #tpu.dimension_semantics<parallel>], iteration_bounds = array<i64: 1, 1>, scalar_prefetch = 0 : i64, scratch_operands = 0 : i64, tpu.core_type = #tpu.core_type<tc>, window_params = [{transform_indices = @transform_0, window_bounds = array<i64: 16, 64>}, {pipeline_mode = #tpu.pipeline_mode<synchronous>, transform_indices = @transform_1, window_bounds = array<i64: 64, 32>}, {pipeline_mode = #tpu.pipeline_mode<synchronous>, transform_indices = @transform_2, window_bounds = array<i64: 1, 32>}, {transform_indices = @transform_3, window_bounds = array<i64: 16, 32>}, {transform_indices = @transform_4, window_bounds = array<i64: 1, 1, 32>}, {transform_indices = @transform_5, window_bounds = array<i64: 1, 1, 32>}]} {
    %c0 = arith.constant 0 : index
    %c0_0 = arith.constant 0 : index
    %0 = vector.load %arg2[%c0, %c0_0] : memref<16x64xbf16, #tpu.memory_space<vmem>>, vector<16x64xbf16>
    %c0_1 = arith.constant 0 : index
    %c0_2 = arith.constant 0 : index
    %1 = vector.load %arg3[%c0_1, %c0_2] : memref<64x32xbf16, #tpu.memory_space<vmem>>, vector<64x32xbf16>
    %cst = arith.constant dense<0.000000e+00> : vector<16x32xf32>
    %2 = tpu.matmul %0, %1, %cst {dimension_numbers = #tpu.dot_dimension_numbers<[1], [0], [0], [1], [0, 0, 1, 1], [], []>} : vector<16x64xbf16>, vector<64x32xbf16>, vector<16x32xf32> -> vector<16x32xf32>
    %c0_3 = arith.constant 0 : index
    %c0_4 = arith.constant 0 : index
    %3 = vector.load %arg4[%c0_3, %c0_4] : memref<1x32xf32, #tpu.memory_space<vmem>>, vector<1x32xf32>
    %4 = vector.broadcast %3 : vector<1x32xf32> to vector<16x32xf32>
    %5 = arith.addf %2, %4 : vector<16x32xf32>
    %6 = arith.truncf %5 : vector<16x32xf32> to vector<16x32xbf16>
    %c0_5 = arith.constant 0 : index
    %c0_6 = arith.constant 0 : index
    %7 = vector.load %arg5[%c0_5, %c0_6] : memref<16x32xbf16, #tpu.memory_space<vmem>>, vector<16x32xbf16>
    tpu.vector_store %arg5[%c0_5, %c0_6], %6 {strides = array<i32>} : memref<16x32xbf16, #tpu.memory_space<vmem>>, vector<16x32xbf16>,
    %8 = arith.extf %6 : vector<16x32xbf16> to vector<16x32xf32>
    %cst_7 = arith.constant dense<0.000000e+00> : vector<32xf32>
    %9 = vector.multi_reduction <add>, %8, %cst_7 [0] : vector<16x32xf32> to vector<32xf32>
    %10 = vector.shape_cast %9 : vector<32xf32> to vector<1x32xf32>
    %cst_8 = arith.constant 6.250000e-02 : f32
    %11 = vector.broadcast %cst_8 : f32 to vector<1x32xf32>
    %12 = arith.mulf %10, %11 : vector<1x32xf32>
    %13 = vector.broadcast %12 : vector<1x32xf32> to vector<16x32xf32>
    %14 = arith.subf %8, %13 : vector<16x32xf32>
    %15 = vector.shape_cast %10 : vector<1x32xf32> to vector<1x1x32xf32>
    %c0_9 = arith.constant 0 : index
    %c0_10 = arith.constant 0 : index
    %c0_11 = arith.constant 0 : index
    %16 = vector.load %arg6[%c0_9, %c0_10, %c0_11] : memref<1x1x32xf32, #tpu.memory_space<vmem>>, vector<1x1x32xf32>
    tpu.vector_store %arg6[%c0_9, %c0_10, %c0_11], %15 {strides = array<i32>} : memref<1x1x32xf32, #tpu.memory_space<vmem>>, vector<1x1x32xf32>,
    %17 = arith.mulf %14, %14 : vector<16x32xf32>
    %cst_12 = arith.constant dense<0.000000e+00> : vector<32xf32>
    %18 = vector.multi_reduction <add>, %17, %cst_12 [0] : vector<16x32xf32> to vector<32xf32>
    %19 = vector.shape_cast %18 : vector<32xf32> to vector<1x32xf32>
    %20 = vector.shape_cast %19 : vector<1x32xf32> to vector<1x1x32xf32>
    %c0_13 = arith.constant 0 : index
    %c0_14 = arith.constant 0 : index
    %c0_15 = arith.constant 0 : index
    %21 = vector.load %arg7[%c0_13, %c0_14, %c0_15] : memref<1x1x32xf32, #tpu.memory_space<vmem>>, vector<1x1x32xf32>
    tpu.vector_store %arg7[%c0_13, %c0_14, %c0_15], %20 {strides = array<i32>} : memref<1x1x32xf32, #tpu.memory_space<vmem>>, vector<1x1x32xf32>,
    return
  }
  func.func @transform_0(%arg0: i32, %arg1: i32) -> (i32, i32) {
    %c0_i32 = arith.constant 0 : i32
    %c0_i32_0 = arith.constant 0 : i32
    return %arg1, %c0_i32 : i32, i32
  }
  func.func @transform_1(%arg0: i32, %arg1: i32) -> (i32, i32) {
    %c0_i32 = arith.constant 0 : i32
    %c0_i32_0 = arith.constant 0 : i32
    return %c0_i32, %arg0 : i32, i32
  }
  func.func @transform_2(%arg0: i32, %arg1: i32) -> (i32, i32) {
    %c0_i32 = arith.constant 0 : i32
    %c0_i32_0 = arith.constant 0 : i32
    return %c0_i32, %arg0 : i32, i32
  }
  func.func @transform_3(%arg0: i32, %arg1: i32) -> (i32, i32) {
    %c0_i32 = arith.constant 0 : i32
    return %arg1, %arg0 : i32, i32
  }
  func.func @transform_4(%arg0: i32, %arg1: i32) -> (i32, i32, i32) {
    %c0_i32 = arith.constant 0 : i32
    %c0_i32_0 = arith.constant 0 : i32
    return %arg1, %c0_i32, %arg0 : i32, i32, i32
  }
  func.func @transform_5(%arg0: i32, %arg1: i32) -> (i32, i32, i32) {
    %c0_i32 = arith.constant 0 : i32
    %c0_i32_0 = arith.constant 0 : i32
    return %arg1, %c0_i32, %arg0 : i32, i32, i32
  }
}

module attributes {stable_mosaic.version = 11 : i64} {
  func.func @_matmul_bias_kernel(%arg0: i32, %arg1: i32, %arg2: memref<16x32xbf16, #tpu.memory_space<vmem>>, %arg3: memref<32x16xbf16, #tpu.memory_space<vmem>>, %arg4: memref<1x16xf32, #tpu.memory_space<vmem>>, %arg5: memref<16x16xf32, #tpu.memory_space<vmem>>) attributes {dimension_semantics = [#tpu.dimension_semantics<parallel>, #tpu.dimension_semantics<parallel>], iteration_bounds = array<i64: 1, 1>, scalar_prefetch = 0 : i64, scratch_operands = 0 : i64, tpu.core_type = #tpu.core_type<tc>, window_params = [{transform_indices = @transform_0, window_bounds = array<i64: 16, 32>}, {pipeline_mode = #tpu.pipeline_mode<synchronous>, transform_indices = @transform_1, window_bounds = array<i64: 32, 16>}, {pipeline_mode = #tpu.pipeline_mode<synchronous>, transform_indices = @transform_2, window_bounds = array<i64: 1, 16>}, {transform_indices = @transform_3, window_bounds = array<i64: 16, 16>}]} {
    %c0 = arith.constant 0 : index
    %c0_0 = arith.constant 0 : index
    %0 = vector.load %arg2[%c0, %c0_0] : memref<16x32xbf16, #tpu.memory_space<vmem>>, vector<16x32xbf16>
    %c0_1 = arith.constant 0 : index
    %c0_2 = arith.constant 0 : index
    %1 = vector.load %arg3[%c0_1, %c0_2] : memref<32x16xbf16, #tpu.memory_space<vmem>>, vector<32x16xbf16>
    %cst = arith.constant dense<0.000000e+00> : vector<16x16xf32>
    %2 = tpu.matmul %0, %1, %cst {dimension_numbers = #tpu.dot_dimension_numbers<[1], [0], [0], [1], [0, 0, 1, 1], [], []>} : vector<16x32xbf16>, vector<32x16xbf16>, vector<16x16xf32> -> vector<16x16xf32>
    %c0_3 = arith.constant 0 : index
    %c0_4 = arith.constant 0 : index
    %3 = vector.load %arg4[%c0_3, %c0_4] : memref<1x16xf32, #tpu.memory_space<vmem>>, vector<1x16xf32>
    %4 = vector.broadcast %3 : vector<1x16xf32> to vector<16x16xf32>
    %5 = arith.addf %2, %4 : vector<16x16xf32>
    %c0_5 = arith.constant 0 : index
    %c0_6 = arith.constant 0 : index
    %6 = vector.load %arg5[%c0_5, %c0_6] : memref<16x16xf32, #tpu.memory_space<vmem>>, vector<16x16xf32>
    tpu.vector_store %arg5[%c0_5, %c0_6], %5 {strides = array<i32>} : memref<16x16xf32, #tpu.memory_space<vmem>>, vector<16x16xf32>,
    return
  }
  func.func @transform_0(%arg0: i32, %arg1: i32) -> (i32, i32) {
    %c0_i32 = arith.constant 0 : i32
    %c0_i32_0 = arith.constant 0 : i32
    return %arg1, %c0_i32 : i32, i32
  }
  func.func @transform_1(%arg0: i32, %arg1: i32) -> (i32, i32) {
    %c0_i32 = arith.constant 0 : i32
    %c0_i32_0 = arith.constant 0 : i32
    return %c0_i32, %arg0 : i32, i32
  }
  func.func @transform_2(%arg0: i32, %arg1: i32) -> (i32, i32) {
    %c0_i32 = arith.constant 0 : i32
    %c0_i32_0 = arith.constant 0 : i32
    return %c0_i32, %arg0 : i32, i32
  }
  func.func @transform_3(%arg0: i32, %arg1: i32) -> (i32, i32) {
    %c0_i32 = arith.constant 0 : i32
    return %arg1, %arg0 : i32, i32
  }
}

</mosaic_0001>

<bundles_post_ra>
// kernel: output_layer.3
= control target key start
LH: loop header
LB: loop body
LE: loop exit
PB: predicated region body
PF: predicated region fallthrough
CT: control target
= control target key end

     0   :  { %v172_v0 = vmov 0.0   ;;  %vm173_vm0 = vmmov 0   ;;  %vm48_vm1 = vcmask 261120   ;;  %vm103_vm2 = vcmask 519168   ;;  %s234_s1 = inlined_call_operand.vmem [shape: bf16[32,64], index: 1, kind: input, shape index: {}]   ;;  %s235_s0 = inlined_call_operand.vmem [shape: bf16[16,32], index: 0, kind: input, shape index: {}]   ;;  %s236_s2 = inlined_call_operand.vmem [shape: f32[1,64], index: 2, kind: input, shape index: {}]   ;;  %s237_s3 = inlined_call_operand.vmem [shape: bf16[16,64], index: 3, kind: output, shape index: {0}]   ;;  %s238_s4 = inlined_call_operand.vmem [shape: f32[1,1,64], index: 4, kind: output, shape index: {1}]   ;;  %s239_s5 = inlined_call_operand.vmem [shape: f32[1,1,64], index: 5, kind: output, shape index: {2}]  }
   0x1   :  { %159 = vmatprep.subr.bf16.mxu0 %v172_v0  ;;  %v169_v1 = vld [vmem:[%s234_s1] sm:$0xff]   ;;  %163 = vmatprep.mubr.msk.bf16.mxu0 %vm173_vm0, %v172_v0  ;;  %v170_v2 = vld [vmem:[%s234_s1 + $0x8] sm:$0xff]   ;;  %vm108_vm3 = vcmask 523264   ;;  %vm121_vm4 = vcmask 516096  }
   0x2   :  { %160 = vmatpush3.bf16.msra.mxu0 %v169_v1  ;;  %v171_v3 = vld [vmem:[%s235_s0] sm:$0xff]  }
   0x3   :  { %161 = vmatprep.subr.bf16.mxu0 %v172_v0  ;;  %v147_v4 = vld [vmem:[%s236_s2] ss:$0 sm:$0xff] }
   0x6   :  { %162 = vmatpush3.bf16.msra.mxu0 %v170_v2 }
   0x9   :  { %164 = vmatmul.mubr.msk.bf16.vlgmr.msra.gmra.mrb[0].mxu0 %vm48_vm1, %v171_v3 }
  0xdc   :  { %v86_v5 = vpop.f32.mrb[0].mxu0 }
  0xdd   :  { %v87_v6 = vadd.f32 %v147_v4, %v86_v5  ;;  %v165_v7 = vpop.f32.mrb[1].mxu0 }
  0xde   :  { %v89_v8 = vpop.f32.mrb[2].mxu0 }
  0xdf   :  { %v93_v9 = vmax.f32 %v87_v6, 0.0  ;;  %v90_v10 = vadd.f32 %v147_v4, %v89_v8  ;;  %v166_v11 = vpop.f32.mrb[3].mxu0 }
  0xe1   :  { %v154_v12 = vpack.c.bf16 %v93_v9, %v93_v9  ;;  %v94_v13 = vmax.f32 %v90_v10, 0.0 }
  0xe3   :  { %104 = vst.msk [vmem:[%s237_s3] sm:$0xf] %vm103_vm2, %v154_v12  ;;  %v95_v14 = vpack.c.bf16 %v94_v13, %v93_v9  ;;  %v155_v15 = vpack.c.bf16 %v94_v13, %v94_v13 }
  0xe5   :  { %105 = vst.msk [vmem:[%s237_s3 + $0x4] sm:$0xf] %vm103_vm2, %v155_v15  ;;  %v106_v16 = vunpack.c.l.bf16 %v95_v14  ;;  %v107_v17 = vunpack.c.h.bf16 %v95_v14 }
  0xe7   :  { %v109_v18 = vsel %vm108_vm3, %v106_v16, 0.0  ;;  %v110_v19 = vsel %vm108_vm3, %v107_v17, 0.0 }
  0xe8   :  { %v111_v20 = vadd.f32 %v110_v19, %v109_v18 }
  0xea   :  { %v112_v21 = vrot.slane %v111_v20, 4 }
  0xec   :  { %v113_v22 = vadd.f32 %v112_v21, %v111_v20 }
  0xee   :  { %v114_v23 = vrot.slane %v113_v22, 2 }
  0xf0   :  { %v115_v24 = vadd.f32 %v114_v23, %v113_v22 }
  0xf2   :  { %v116_v25 = vrot.slane %v115_v24, 1 }
  0xf4   :  { %v117_v26 = vadd.f32 %v116_v25, %v115_v24 }
  0xf6   :  { %v118_v27 = vmul.f32 0.0625, %v117_v26  ;;  %122 = vst.msk [vmem:[%s238_s4] sm:$0x1] %vm121_vm4, %v117_v26 }
  0xf8   :  { %v119_v28 = vsub.f32 %v106_v16, %v118_v27  ;;  %v120_v29 = vsub.f32 %v107_v17, %v118_v27 }
  0xfa   :  { %v123_v30 = vmul.f32 %v119_v28, %v119_v28  ;;  %v124_v31 = vmul.f32 %v120_v29, %v120_v29 }
  0xfc   :  { %v125_v32 = vsel %vm108_vm3, %v123_v30, 0.0  ;;  %v126_v33 = vsel %vm108_vm3, %v124_v31, 0.0 }
  0xfd   :  { %v127_v34 = vadd.f32 %v126_v33, %v125_v32 }
  0xff   :  { %v128_v35 = vrot.slane %v127_v34, 4 }
 0x101   :  { %v129_v36 = vadd.f32 %v128_v35, %v127_v34 }
 0x103   :  { %v130_v37 = vrot.slane %v129_v36, 2 }
 0x105   :  { %v131_v38 = vadd.f32 %v130_v37, %v129_v36 }
 0x107   :  { %v132_v39 = vrot.slane %v131_v38, 1 }
 0x109   :  { %v133_v40 = vadd.f32 %v132_v39, %v131_v38 }
 0x10b   :  { %134 = vst.msk [vmem:[%s239_s5] sm:$0x1] %vm121_vm4, %v133_v40 }

// kernel: output_layer.4
= control target key start
LH: loop header
LB: loop body
LE: loop exit
PB: predicated region body
PF: predicated region fallthrough
CT: control target
= control target key end

     0   :  { %v196_v0 = vmov 0.0   ;;  %vm197_vm0 = vmmov 0   ;;  %vm64_vm1 = vcmask 523264   ;;  %vm117_vm2 = vcmask 257024   ;;  %s264_s1 = inlined_call_operand.vmem [shape: bf16[64,32], index: 1, kind: input, shape index: {}]   ;;  %s265_s0 = inlined_call_operand.vmem [shape: bf16[16,64], index: 0, kind: input, shape index: {}]   ;;  %s266_s2 = inlined_call_operand.vmem [shape: f32[1,32], index: 2, kind: input, shape index: {}]   ;;  %s267_s3 = inlined_call_operand.vmem [shape: bf16[16,32], index: 3, kind: output, shape index: {0}]   ;;  %s268_s4 = inlined_call_operand.vmem [shape: f32[1,1,32], index: 4, kind: output, shape index: {1}]   ;;  %s269_s5 = inlined_call_operand.vmem [shape: f32[1,1,32], index: 5, kind: output, shape index: {2}]  }
   0x1   :  { %177 = vmatprep.subr.bf16.mxu0 %v196_v0  ;;  %v191_v1 = vld [vmem:[%s264_s1] sm:$0xff]   ;;  %185 = vmatprep.mubr.msk.bf16.mxu0 %vm197_vm0, %v196_v0  ;;  %v192_v2 = vld [vmem:[%s264_s1 + $0x8] sm:$0xff]   ;;  %v193_v3 = vld [vmem:[%s264_s1 + $0x10] sm:$0xff]   ;;  %vm122_vm3 = vcmask 261120   ;;  %vm135_vm4 = vcmask 253952  }
   0x2   :  { %178 = vmatpush3.bf16.msra.mxu0 %v191_v1  ;;  %v194_v4 = vld [vmem:[%s264_s1 + $0x18] sm:$0xff]   ;;  %v195_v5 = vld [vmem:[%s265_s0] sm:$0xff]  }
   0x3   :  { %179 = vmatprep.subr.bf16.mxu0 %v196_v0  ;;  %v161_v6 = vld [vmem:[%s266_s2] ss:$0 sm:$0xff] }
   0x6   :  { %180 = vmatpush3.bf16.msra.mxu0 %v192_v2 }
   0x7   :  { %181 = vmatprep.subr.bf16.mxu0 %v196_v0 }
   0xa   :  { %182 = vmatpush3.bf16.msra.mxu0 %v193_v3 }
   0xb   :  { %183 = vmatprep.subr.bf16.mxu0 %v196_v0 }
   0xe   :  { %184 = vmatpush3.bf16.msra.mxu0 %v194_v4 }
  0x11   :  { %186 = vmatmul.mubr.msk.bf16.vlgmr.msra.gmra.mrb[0].mxu0 %vm64_vm1, %v195_v5 }
  0xe4   :  { %v102_v7 = vpop.f32.mrb[0].mxu0 }
  0xe5   :  { %v103_v8 = vadd.f32 %v161_v6, %v102_v7  ;;  %v187_v9 = vpop.f32.mrb[1].mxu0 }
  0xe6   :  { %v105_v10 = vpop.f32.mrb[2].mxu0 }
  0xe7   :  { %v170_v11 = vpack.c.bf16 %v103_v8, %v103_v8  ;;  %v106_v12 = vadd.f32 %v161_v6, %v105_v10  ;;  %v188_v13 = vpop.f32.mrb[3].mxu0 }
  0xe9   :  { %118 = vst.msk [vmem:[%s267_s3] sm:$0xf] %vm117_vm2, %v170_v11  ;;  %v109_v14 = vpack.c.bf16 %v106_v12, %v103_v8  ;;  %v171_v15 = vpack.c.bf16 %v106_v12, %v106_v12 }
  0xeb   :  { %119 = vst.msk [vmem:[%s267_s3 + $0x4] sm:$0xf] %vm117_vm2, %v171_v15  ;;  %v120_v16 = vunpack.c.l.bf16 %v109_v14  ;;  %v121_v17 = vunpack.c.h.bf16 %v109_v14 }
  0xed   :  { %v123_v18 = vsel %vm122_vm3, %v120_v16, 0.0  ;;  %v124_v19 = vsel %vm122_vm3, %v121_v17, 0.0 }
  0xee   :  { %v125_v20 = vadd.f32 %v124_v19, %v123_v18 }
  0xf0   :  { %v126_v21 = vrot.slane %v125_v20, 4 }
  0xf2   :  { %v127_v22 = vadd.f32 %v126_v21, %v125_v20 }
  0xf4   :  { %v128_v23 = vrot.slane %v127_v22, 2 }
  0xf6   :  { %v129_v24 = vadd.f32 %v128_v23, %v127_v22 }
  0xf8   :  { %v130_v25 = vrot.slane %v129_v24, 1 }
  0xfa   :  { %v131_v26 = vadd.f32 %v130_v25, %v129_v24 }
  0xfc   :  { %v132_v27 = vmul.f32 0.0625, %v131_v26  ;;  %136 = vst.msk [vmem:[%s268_s4] sm:$0x1] %vm135_vm4, %v131_v26 }
  0xfe   :  { %v133_v28 = vsub.f32 %v120_v16, %v132_v27  ;;  %v134_v29 = vsub.f32 %v121_v17, %v132_v27 }
 0x100   :  { %v137_v30 = vmul.f32 %v133_v28, %v133_v28  ;;  %v138_v31 = vmul.f32 %v134_v29, %v134_v29 }
 0x102   :  { %v139_v32 = vsel %vm122_vm3, %v137_v30, 0.0  ;;  %v140_v33 = vsel %vm122_vm3, %v138_v31, 0.0 }
 0x103   :  { %v141_v34 = vadd.f32 %v140_v33, %v139_v32 }
 0x105   :  { %v142_v35 = vrot.slane %v141_v34, 4 }
 0x107   :  { %v143_v36 = vadd.f32 %v142_v35, %v141_v34 }
 0x109   :  { %v144_v37 = vrot.slane %v143_v36, 2 }
 0x10b   :  { %v145_v38 = vadd.f32 %v144_v37, %v143_v36 }
 0x10d   :  { %v146_v39 = vrot.slane %v145_v38, 1 }
 0x10f   :  { %v147_v40 = vadd.f32 %v146_v39, %v145_v38 }
 0x111   :  { %148 = vst.msk [vmem:[%s269_s5] sm:$0x1] %vm135_vm4, %v147_v40 }

// kernel: output_layer.5
= control target key start
LH: loop header
LB: loop body
LE: loop exit
PB: predicated region body
PF: predicated region fallthrough
CT: control target
= control target key end

     0   :  { %v158_v1 = vmov 0.0   ;;  %vm159_vm0 = vmmov 0   ;;  %s207_s0 = inlined_call_operand.vmem [shape: bf16[16,32], index: 0, kind: input, shape index: {}]   ;;  %s208_s1 = inlined_call_operand.vmem [shape: bf16[32,16], index: 1, kind: input, shape index: {}]   ;;  %s209_s2 = inlined_call_operand.vmem [shape: f32[1,16], index: 2, kind: input, shape index: {}]   ;;  %s210_s3 = inlined_call_operand.hbm [shape: f32[16,16], index: 3, kind: output, shape index: {}]  }
   0x1   :  { %v131_v0 = vld [vmem:[%s208_s1] sm:$0xff]   ;;  %118 = vmatprep.subr.bf16.mxu0 %v158_v1  ;;  %v132_v2 = vld [vmem:[%s208_s1 + $0x8] sm:$0xff]   ;;  %122 = vmatprep.mubr.msk.bf16.mxu0 %vm159_vm0, %v158_v1 }
   0x2   :  { %119 = vmatpush3.bf16.msra.mxu0 %v131_v0 }
   0x3   :  { %120 = vmatprep.subr.bf16.mxu0 %v158_v1 }
   0x4   :  { %8 = vsyncpa [#allocation3], 0  ;;  %v133_v3 = vld [vmem:[%s207_s0] sm:$0xff]   ;;  %vm46_vm1 = vcmask 261120   ;;  %s160_s20 = smov [#allocation2]   ;;  %vm91_vm2 = vcmask 130048  }
   0x5   :  { %v110_v4 = vld [vmem:[%s209_s2] ss:$0 sm:$0xff]  ;;  %s99_s21 = sshll.u32 %s160_s20, 4  ;;  %s100_s21 = int_to_ptr.vmem [resolvable:$true] %s99_s21 }
   0x6   :  { %121 = vmatpush3.bf16.msra.mxu0 %v132_v2  ;;  %s134_s0 = scalar_lea.vmem %s100_s21, 256  ;;  %p139_p1 = scmp.lt.s32.totalorder %s100_s21, %s100_s21 }
   0x7   :  { %p135_p0 = scmp.ne.s32.totalorder %s100_s21, %s134_s0  ;;  %p140_p2 = scmp.lt.s32.totalorder %s134_s0, %s134_s0 }
   0x9   :  { %123 = vmatmul.mubr.msk.bf16.vlgmr.msra.gmra.mrb[0].mxu0 %vm46_vm1, %v133_v3  ;;  %p141_p3 = por %p140_p2, %p139_p1 }
   0xb   :  { %p142_p4 = pnand %p141_p3, %p135_p0 }
  0xdc   :  { %v84_v5 = vpop.f32.mrb[0].mxu0 }
  0xdd   :  { %v85_v6 = vadd.f32 %v110_v4, %v84_v5  ;;  %v124_v7 = vpop.f32.mrb[1].mxu0 }
  0xde   :  { %v87_v8 = vpop.f32.mrb[2].mxu0 }
  0xdf   :  { %92 = vst.msk [vmem:[#allocation2] sm:$0xff] %vm91_vm2, %v85_v6  ;;  %v88_v9 = vadd.f32 %v110_v4, %v87_v8  ;;  %v125_v10 = vpop.f32.mrb[3].mxu0 }
  0xe1   :  { %93 = vst.msk [vmem:[#allocation2 + $0x8] sm:$0xff] %vm91_vm2, %v88_v9 }
  0xe2   :  { %145 = shalt.err (!%p142_p4)
}
  0xe3   :  { %s146_s22 = scalar_lea.hbm %s210_s3, 256 }
  0xe4   :  { %p147_p5 = scmp.ne.s32.totalorder %s210_s3, %s146_s22  ;;  %p150_p6 = scmp.lt.u32.totalorder %s146_s22, %s210_s3 }
  0xe6   :  { %p152_p7 = pnand %p150_p6, %p147_p5 }
  0xe8   :  { %155 = shalt.err (!%p152_p7)
}
  0xe9   :  { %s161_s27 = smov 128   ;;  %s162_s28 = smov 8  }
  0xea   :  { %105 = dma.vmem_to_hbm [thread:$0]  %s100_s21, 256, %s210_s3, [#allocation3], %s161_s27, %s161_s27, %s162_s28  }
  0xeb   :  { %156 = dma.done.wait [#allocation3], 256  }
  0xec   :  { %157 = vsyncadd [#allocation3], 4294967040 }
  0xed   :  { %109 = vsyncpa [#allocation3], 1 }

</bundles_post_ra>
